<compile_context>
chip_gen: v6e
topology: v6e:2x2x1
jax: 0.10.0
libtpu: 0.0.40
codegen_flags: <defaults>
</compile_context>

<pallas_src>
import jax
import jax.numpy as jnp
from jax.experimental import pallas as pl
from jax.experimental.pallas import tpu as pltpu

LANE = 128
SUB = 8

_VMEM = pl.BlockSpec(memory_space=pltpu.MemorySpace.VMEM)


def _round_up(n, m):
    return ((n + m - 1) // m) * m


def _pad2(a, rows, cols):
    return jnp.pad(a, ((0, rows - a.shape[0]), (0, cols - a.shape[1])))


def _vmem_limit_bytes():
    """Per-generation scoped-VMEM budget (don't hard-code 64 MiB)."""
    try:
        cap = int(pltpu.get_tpu_info().vmem_capacity_bytes)
    except Exception:
        cap = 64 * 1024 * 1024          # conservative fallback (v7x per-TC)
    return max(16 * 1024 * 1024, int(cap * 0.85))


def _pick_row_tile(n_pad, widest, limit):
    """Row-tile height for streaming A: prefer >=512 rows (amortizes per-step
    DMA overhead), shrunk so the int8 A double-buffer + resident operands stay
    well inside the scoped-VMEM budget.  Always divides n_pad (multiple of 128)."""
    tm = 512
    while n_pad % tm:
        tm //= 2

    def footprint(t):
        return (2 * t * n_pad                 # A row tiles (int8), 2 buffers
                + 2 * n_pad * widest * 2      # resident y (bf16)
                + 2 * t * widest * 4          # output tiles (f32), 2 buffers
                + 2 * widest * widest * 2)    # right-multiplier weight (bf16)

    while tm > 128 and footprint(tm) > int(0.6 * limit):
        tm //= 2
    return max(tm, 128)


# ---------------------------------------------------------------------------
# Kernel 1: streamed aggregation (+ fused right Linear):  out = (A @ y) @ W + b
# Grid over row tiles of A; A tiles are DMA'd from HBM and pipelined, y/W/b
# stay resident.  Row-tile axis is "parallel" -> dual-TC sharding on v7x.
# ---------------------------------------------------------------------------
def _agg_linear_kernel(a_ref, y_ref, w_ref, b_ref, o_ref):
    # int8 adjacency row tile -> bf16 on the VPU (MXU sees bf16 on all gens).
    a_bf = a_ref[...].astype(jnp.float32).astype(jnp.bfloat16)
    t = jnp.dot(a_bf, y_ref[...], preferred_element_type=jnp.float32)
    t = jnp.dot(t.astype(jnp.bfloat16), w_ref[...],
                preferred_element_type=jnp.float32) + b_ref[...]
    o_ref[...] = t.astype(o_ref.dtype)


def _agg_linear(a_i8, y_bf, w_bf, b_f32, out_dtype, tm, vmem_limit):
    n_pad = a_i8.shape[0]
    win = y_bf.shape[1]
    wout = w_bf.shape[1]
    return pl.pallas_call(
        _agg_linear_kernel,
        out_shape=jax.ShapeDtypeStruct((n_pad, wout), out_dtype),
        grid=(n_pad // tm,),
        in_specs=[
            pl.BlockSpec((tm, n_pad), lambda i: (i, 0)),    # streamed A rows
            pl.BlockSpec((n_pad, win), lambda i: (0, 0)),   # resident y
            pl.BlockSpec((win, wout), lambda i: (0, 0)),    # resident weight
            pl.BlockSpec((1, wout), lambda i: (0, 0)),      # bias
        ],
        out_specs=pl.BlockSpec((tm, wout), lambda i: (i, 0)),
        compiler_params=pltpu.CompilerParams(
            dimension_semantics=("parallel",),
            vmem_limit_bytes=vmem_limit),
    )(a_i8, y_bf, w_bf, b_f32)


# ---------------------------------------------------------------------------
# Kernel 2: BatchNorm (batch stats over true n rows) + ReLU + Linear2 + ReLU,
# optionally fused with global_add_pool + head MLP on the last layer.
# ---------------------------------------------------------------------------
def _bn_relu_lin2(h, g_ref, be_ref, w2_ref, b2_ref, n_real):
    """BN folded into one scale/shift (2 VPU ops on the [N,hid] tensor),
    two-pass variance in f32, padded rows masked out of the statistics."""
    inv_n = 1.0 / float(n_real)
    rows = jax.lax.broadcasted_iota(jnp.int32, h.shape, 0)
    m = (rows < n_real).astype(jnp.float32)
    mean = jnp.sum(h * m, axis=0, keepdims=True) * inv_n
    d = (h - mean) * m
    var = jnp.sum(d * d, axis=0, keepdims=True) * inv_n
    scale = jax.lax.rsqrt(var + 1e-5) * g_ref[...]
    shift = be_ref[...] - mean * scale
    hn = jnp.maximum(h * scale + shift, 0.0)          # BN + inner ReLU
    h2 = jnp.dot(hn.astype(jnp.bfloat16), w2_ref[...],
                 preferred_element_type=jnp.float32) + b2_ref[...]
    return jnp.maximum(h2, 0.0)                       # outer .relu()


def _make_bn_mlp_kernel(n_real):
    def kernel(h_ref, g_ref, be_ref, w2_ref, b2_ref, o_ref):
        o_ref[...] = _bn_relu_lin2(h_ref[...], g_ref, be_ref, w2_ref, b2_ref,
                                   n_real).astype(o_ref.dtype)
    return kernel


def _make_bn_mlp_pool_head_kernel(n_real):
    def kernel(h_ref, g_ref, be_ref, w2_ref, b2_ref,
               pool_ref, fw1_ref, fb1_ref, fw2_ref, fb2_ref, o_ref):
        x2 = _bn_relu_lin2(h_ref[...], g_ref, be_ref, w2_ref, b2_ref, n_real)
        # global_add_pool(x, batch) as one_hot(batch) @ x (padded cols = 0).
        pooled = jnp.dot(pool_ref[...], x2.astype(jnp.bfloat16),
                         preferred_element_type=jnp.float32)
        t = jnp.dot(pooled.astype(jnp.bfloat16), fw1_ref[...],
                    preferred_element_type=jnp.float32) + fb1_ref[...]
        t = jnp.maximum(t, 0.0)   # head ReLU; Dropout(0.5) is eval-mode identity
        o_ref[...] = jnp.dot(t.astype(jnp.bfloat16), fw2_ref[...],
                             preferred_element_type=jnp.float32) + fb2_ref[...]
    return kernel


def _bn_mlp(h, g, be, w2, b2, n_real, vmem_limit):
    n_pad = h.shape[0]
    return pl.pallas_call(
        _make_bn_mlp_kernel(n_real),
        out_shape=jax.ShapeDtypeStruct((n_pad, w2.shape[1]), jnp.bfloat16),
        in_specs=[_VMEM] * 5,
        out_specs=_VMEM,
        compiler_params=pltpu.CompilerParams(vmem_limit_bytes=vmem_limit),
    )(h, g, be, w2, b2)


def _bn_mlp_pool_head(h, g, be, w2, b2, pool, fw1, fb1, fw2, fb2,
                      n_real, vmem_limit):
    g_pad = pool.shape[0]
    cls_pad = fw2.shape[1]
    return pl.pallas_call(
        _make_bn_mlp_pool_head_kernel(n_real),
        out_shape=jax.ShapeDtypeStruct((g_pad, cls_pad), jnp.float32),
        in_specs=[_VMEM] * 10,
        out_specs=_VMEM,
        compiler_params=pltpu.CompilerParams(vmem_limit_bytes=vmem_limit),
    )(h, g, be, w2, b2, pool, fw1, fb1, fw2, fb2)


# ---------------------------------------------------------------------------
# Host-side graph operators (structure-only -> build once, cache across calls).
# ---------------------------------------------------------------------------
def build_graph_operators(src, dst, edge_mask, sup_mask, batch, num_graphs, n):
    """Dense graph operators in narrow storage dtypes (int8 adjacency, bf16
    pooling), zero-padded to lane multiples.  Entries are small non-negative
    integer edge counts (exact in int8 for <=127 parallel edges)."""
    n_pad = _round_up(n, LANE)
    g_pad = _round_up(num_graphs, SUB)
    a = jnp.zeros((n, n), jnp.int32).at[dst, src].add(1).astype(jnp.int8)
    a_sup = (jnp.zeros((n, n), jnp.int32)
             .at[dst, src].add(edge_mask.astype(jnp.int32)).astype(jnp.int8))
    eye = jnp.eye(n, dtype=jnp.int8)
    # SimpleConv('add') + supernode-row overwrite folded into one matrix.
    a_comb = jnp.where(sup_mask[:, None], a_sup, eye)
    # GINConv eps=0 self term folded in: (1+eps)*x + sum_j x_j == (A + I) @ x.
    a_hat = a + eye
    pool = (batch[None, :] == jnp.arange(num_graphs)[:, None]).astype(jnp.bfloat16)
    return (_pad2(a_comb, n_pad, n_pad),
            _pad2(a_hat, n_pad, n_pad),
            _pad2(pool, g_pad, n_pad))


# ---------------------------------------------------------------------------
# Forward driver.
# ---------------------------------------------------------------------------
def gin_forward(x, src, dst, edge_mask, sup_mask, batch, num_graphs,
                layer_params, head_params, graph_ops=None):
    n, c_in = x.shape
    num_layers = len(layer_params)
    hid = layer_params[0][0].shape[1]
    num_classes = head_params[2].shape[-1]

    n_pad = _round_up(n, LANE)
    c_pad = _round_up(c_in, LANE)
    hid_pad = _round_up(hid, LANE)
    cls_pad = _round_up(num_classes, LANE)

    if graph_ops is None:
        graph_ops = build_graph_operators(src, dst, edge_mask, sup_mask,
                                          batch, num_graphs, n)
    a_comb, a_hat, pool = graph_ops

    vmem_limit = _vmem_limit_bytes()
    tm = _pick_row_tile(n_pad, max(c_pad, hid_pad), vmem_limit)

    # Node features / weights padded to lane multiples (zero padding is
    # absorbed by zero weight rows; gamma/beta padding = 0 keeps padded
    # channels exactly zero through BN).
    x_p = _pad2(x, n_pad, c_pad).astype(jnp.bfloat16)

    lp = []
    prev = c_pad
    for (w1, b1, g, be, w2, b2) in layer_params:
        lp.append((
            _pad2(w1, prev, hid_pad).astype(jnp.bfloat16),
            _pad2(b1, 1, hid_pad).astype(jnp.float32),
            _pad2(g, 1, hid_pad).astype(jnp.float32),
            _pad2(be, 1, hid_pad).astype(jnp.float32),
            _pad2(w2, hid_pad, hid_pad).astype(jnp.bfloat16),
            _pad2(b2, 1, hid_pad).astype(jnp.float32),
        ))
        prev = hid_pad

    fw1, fb1, fw2, fb2 = head_params
    fw1_p = _pad2(fw1, hid_pad, hid_pad).astype(jnp.bfloat16)
    fb1_p = _pad2(fb1, 1, hid_pad).astype(jnp.float32)
    fw2_p = _pad2(fw2, hid_pad, cls_pad).astype(jnp.bfloat16)
    fb2_p = _pad2(fb2, 1, cls_pad).astype(jnp.float32)

    zeros_c = jnp.zeros((1, c_pad), jnp.float32)
    zeros_h = jnp.zeros((1, hid_pad), jnp.float32)

    w1_0, b1_0 = lp[0][0], lp[0][1]
    x_cur = None
    if c_pad > hid_pad:
        # Reassociate layer-1: A_hat @ (x @ W1) instead of (A_hat @ x) @ W1 —
        # fold W1 into the supernode aggregation so the N^2-scale streamed
        # matmul runs at width hid_pad instead of c_pad.
        y = _agg_linear(a_comb, x_p, w1_0, zeros_h, jnp.bfloat16, tm, vmem_limit)
        eye_h = jnp.eye(hid_pad, dtype=jnp.bfloat16)
        h = _agg_linear(a_hat, y, eye_h, b1_0, jnp.float32, tm, vmem_limit)
    else:
        # Supernode update: x <- A_comb @ x  (identity right-multiplier).
        eye_c = jnp.eye(c_pad, dtype=jnp.bfloat16)
        x_cur = _agg_linear(a_comb, x_p, eye_c, zeros_c, jnp.bfloat16,
                            tm, vmem_limit)
        # Layer-1 aggregation + Linear1 fused:  h = (A_hat @ x) @ W1 + b1.
        h = _agg_linear(a_hat, x_cur, w1_0, b1_0, jnp.float32, tm, vmem_limit)

    out = None
    for l in range(num_layers):
        w1, b1, g, be, w2, b2 = lp[l]
        if l > 0:
            h = _agg_linear(a_hat, x_cur, w1, b1, jnp.float32, tm, vmem_limit)
        if l < num_layers - 1:
            x_cur = _bn_mlp(h, g, be, w2, b2, n, vmem_limit)
        else:
            out = _bn_mlp_pool_head(h, g, be, w2, b2, pool,
                                    fw1_p, fb1_p, fw2_p, fb2_p, n, vmem_limit)
    return out[:num_graphs, :num_classes]


# ---------------------------------------------------------------------------
# Deterministic small example.
# ---------------------------------------------------------------------------
def _build_example():
    # 2 graphs x 8 nodes, node 0 of each graph is the supernode.
    nodes_per_graph = 8
    num_graphs = 2
    n = nodes_per_graph * num_graphs
    in_channels = 4
    hidden = 32
    num_classes = 3
    num_layers = 2

    src_list, dst_list = [], []
    for g in range(num_graphs):
        base = g * nodes_per_graph
        for i in range(1, nodes_per_graph - 1):          # ring among 1..7
            a, b = base + i, base + i + 1
            src_list += [a, b]
            dst_list += [b, a]
        for i in range(1, nodes_per_graph):               # node <-> supernode
            src_list += [base + i, base]
            dst_list += [base, base + i]
    src = jnp.array(src_list, dtype=jnp.int32)
    dst = jnp.array(dst_list, dtype=jnp.int32)
    e = src.shape[0]
    edge_mask = (jnp.arange(e) % 3 != 0).astype(jnp.float32)

    sup_mask = (jnp.arange(n) % nodes_per_graph) == 0
    batch = jnp.arange(n) // nodes_per_graph

    key = jax.random.PRNGKey(0)
    keys = iter(jax.random.split(key, 32))

    def lin(kin, kout):
        w = jax.random.normal(next(keys), (kin, kout), jnp.float32) * 0.2
        b = jax.random.normal(next(keys), (1, kout), jnp.float32) * 0.05
        return w, b

    layer_params = []
    c_in = in_channels
    for _ in range(num_layers):
        w1, b1 = lin(c_in, hidden)
        gamma = jnp.ones((1, hidden), jnp.float32)
        beta = jnp.zeros((1, hidden), jnp.float32)
        w2, b2 = lin(hidden, hidden)
        layer_params.append((w1, b1, gamma, beta, w2, b2))
        c_in = hidden

    fw1, fb1 = lin(hidden, hidden)
    fw2, fb2 = lin(hidden, num_classes)
    head_params = (fw1, fb1, fw2, fb2)

    x = jax.random.normal(next(keys), (n, in_channels), jnp.float32)
    return (x, src, dst, edge_mask, sup_mask, batch, num_graphs,
            layer_params, head_params)


if __name__ == "__main__":
    (x, src, dst, edge_mask, sup_mask, batch, num_graphs,
     layer_params, head_params) = _build_example()
    # Graph operators depend only on structure: build once, reuse across calls.
    graph_ops = build_graph_operators(src, dst, edge_mask, sup_mask, batch,
                                      num_graphs, x.shape[0])
    out = gin_forward(x, src, dst, edge_mask, sup_mask, batch, num_graphs,
                      layer_params, head_params, graph_ops=graph_ops)
    jax.block_until_ready(out)
    assert out.shape == (num_graphs, head_params[2].shape[-1])
    print("KERNEL_OK")
</pallas_src>

<mosaic_0001>
module attributes {stable_mosaic.version = 11 : i64} {
  func.func @_agg_linear_kernel(%arg0: i32, %arg1: memref<128x128xi8, #tpu.memory_space<vmem>>, %arg2: memref<128x128xbf16, #tpu.memory_space<vmem>>, %arg3: memref<128x128xbf16, #tpu.memory_space<vmem>>, %arg4: memref<1x128xf32, #tpu.memory_space<vmem>>, %arg5: memref<128x128xbf16, #tpu.memory_space<vmem>>) attributes {dimension_semantics = [#tpu.dimension_semantics<parallel>], iteration_bounds = array<i64: 1>, scalar_prefetch = 0 : i64, scratch_operands = 0 : i64, tpu.core_type = #tpu.core_type<tc>, window_params = [{transform_indices = @transform_0, window_bounds = array<i64: 128, 128>}, {pipeline_mode = #tpu.pipeline_mode<synchronous>, transform_indices = @transform_1, window_bounds = array<i64: 128, 128>}, {pipeline_mode = #tpu.pipeline_mode<synchronous>, transform_indices = @transform_2, window_bounds = array<i64: 128, 128>}, {pipeline_mode = #tpu.pipeline_mode<synchronous>, transform_indices = @transform_3, window_bounds = array<i64: 1, 128>}, {transform_indices = @transform_4, window_bounds = array<i64: 128, 128>}]} {
    %c0 = arith.constant 0 : index
    %c0_0 = arith.constant 0 : index
    %0 = vector.load %arg1[%c0, %c0_0] : memref<128x128xi8, #tpu.memory_space<vmem>>, vector<128x128xi8>
    %1 = arith.sitofp %0 : vector<128x128xi8> to vector<128x128xf32>
    %2 = arith.truncf %1 : vector<128x128xf32> to vector<128x128xbf16>
    %c0_1 = arith.constant 0 : index
    %c0_2 = arith.constant 0 : index
    %3 = vector.load %arg2[%c0_1, %c0_2] : memref<128x128xbf16, #tpu.memory_space<vmem>>, vector<128x128xbf16>
    %cst = arith.constant dense<0.000000e+00> : vector<128x128xf32>
    %4 = tpu.matmul %2, %3, %cst {dimension_numbers = #tpu.dot_dimension_numbers<[1], [0], [0], [1], [0, 0, 1, 1], [], []>} : vector<128x128xbf16>, vector<128x128xbf16>, vector<128x128xf32> -> vector<128x128xf32>
    %5 = arith.truncf %4 : vector<128x128xf32> to vector<128x128xbf16>
    %c0_3 = arith.constant 0 : index
    %c0_4 = arith.constant 0 : index
    %6 = vector.load %arg3[%c0_3, %c0_4] : memref<128x128xbf16, #tpu.memory_space<vmem>>, vector<128x128xbf16>
    %cst_5 = arith.constant dense<0.000000e+00> : vector<128x128xf32>
    %7 = tpu.matmul %5, %6, %cst_5 {dimension_numbers = #tpu.dot_dimension_numbers<[1], [0], [0], [1], [0, 0, 1, 1], [], []>} : vector<128x128xbf16>, vector<128x128xbf16>, vector<128x128xf32> -> vector<128x128xf32>
    %c0_6 = arith.constant 0 : index
    %c0_7 = arith.constant 0 : index
    %8 = vector.load %arg4[%c0_6, %c0_7] : memref<1x128xf32, #tpu.memory_space<vmem>>, vector<1x128xf32>
    %9 = vector.broadcast %8 : vector<1x128xf32> to vector<128x128xf32>
    %10 = arith.addf %7, %9 : vector<128x128xf32>
    %11 = arith.truncf %10 : vector<128x128xf32> to vector<128x128xbf16>
    %c0_8 = arith.constant 0 : index
    %c0_9 = arith.constant 0 : index
    %12 = vector.load %arg5[%c0_8, %c0_9] : memref<128x128xbf16, #tpu.memory_space<vmem>>, vector<128x128xbf16>
    tpu.vector_store %arg5[%c0_8, %c0_9], %11 {strides = array<i32>} : memref<128x128xbf16, #tpu.memory_space<vmem>>, vector<128x128xbf16>,
    return
  }
  func.func @transform_0(%arg0: i32) -> (i32, i32) {
    %c0_i32 = arith.constant 0 : i32
    %c0_i32_0 = arith.constant 0 : i32
    return %arg0, %c0_i32 : i32, i32
  }
  func.func @transform_1(%arg0: i32) -> (i32, i32) {
    %c0_i32 = arith.constant 0 : i32
    %c0_i32_0 = arith.constant 0 : i32
    %c0_i32_1 = arith.constant 0 : i32
    return %c0_i32, %c0_i32_0 : i32, i32
  }
  func.func @transform_2(%arg0: i32) -> (i32, i32) {
    %c0_i32 = arith.constant 0 : i32
    %c0_i32_0 = arith.constant 0 : i32
    %c0_i32_1 = arith.constant 0 : i32
    return %c0_i32, %c0_i32_0 : i32, i32
  }
  func.func @transform_3(%arg0: i32) -> (i32, i32) {
    %c0_i32 = arith.constant 0 : i32
    %c0_i32_0 = arith.constant 0 : i32
    %c0_i32_1 = arith.constant 0 : i32
    return %c0_i32, %c0_i32_0 : i32, i32
  }
  func.func @transform_4(%arg0: i32) -> (i32, i32) {
    %c0_i32 = arith.constant 0 : i32
    %c0_i32_0 = arith.constant 0 : i32
    return %arg0, %c0_i32 : i32, i32
  }
}

</mosaic_0001>

<bundles_post_ra>
// kernel: tpu_custom_call.1
= control target key start
LH: loop header
LB: loop body
LE: loop exit
PB: predicated region body
PF: predicated region fallthrough
CT: control target
= control target key end

     0   :  { %9 = vsyncpa [#allocation3], 0  ;;  %s866_s0 = inlined_call_operand.hbm [shape: s8[128,128], index: 0, kind: input, shape index: {}]   ;;  %s867_s1 = inlined_call_operand.hbm [shape: bf16[128,128], index: 1, kind: input, shape index: {}]   ;;  %s868_s2 = inlined_call_operand.hbm [shape: bf16[128,128], index: 2, kind: input, shape index: {}]   ;;  %s869_s3 = inlined_call_operand.vmem [shape: f32[1,128], index: 3, kind: input, shape index: {}]   ;;  %s870_s4 = inlined_call_operand.hbm [shape: bf16[128,128], index: 4, kind: output, shape index: {}]  }
   0x1   :  { %10 = vsyncpa [#allocation6], 0 }
   0x2   :  { %11 = vsyncpa [#allocation4], 0  ;;  %s809_s15 = smov [#allocation5]  }
   0x3   :  { %s29_s16 = sshll.u32 %s809_s15, 4  ;;  %s30_s16 = int_to_ptr.vmem [resolvable:$true] %s29_s16 }
   0x4   :  { %s731_s17 = scalar_lea.vmem %s30_s16, 1024  ;;  %p736_p1 = scmp.lt.s32.totalorder %s30_s16, %s30_s16 }
   0x5   :  { %p732_p0 = scmp.ne.s32.totalorder %s30_s16, %s731_s17  ;;  %p737_p2 = scmp.lt.s32.totalorder %s731_s17, %s731_s17 }
   0x7   :  { %p738_p3 = por %p737_p2, %p736_p1 }
   0x9   :  { %p739_p4 = pnand %p738_p3, %p732_p0 }
   0xb   :  { %742 = shalt.err (!%p739_p4)
}
   0xc   :  { %s810_s18 = smov 64   ;;  %s811_s19 = smov 4  }
   0xd   :  { %35 = dma.hbm_to_vmem [thread:$0]  %s867_s1, 1024, %s30_s16, [#allocation6], %s810_s18, %s810_s18, %s811_s19  }
   0xe   :  { %s812_s22 = smov [#allocation2]  }
   0xf   :  { %s17_s23 = sshll.u32 %s812_s22, 4  ;;  %s18_s23 = int_to_ptr.vmem [resolvable:$true] %s17_s23 }
  0x10   :  { %s751_s24 = scalar_lea.vmem %s18_s23, 512  ;;  %p756_p6 = scmp.lt.s32.totalorder %s18_s23, %s18_s23 }
  0x11   :  { %p752_p5 = scmp.ne.s32.totalorder %s18_s23, %s751_s24  ;;  %p757_p7 = scmp.lt.s32.totalorder %s751_s24, %s751_s24 }
  0x13   :  { %p758_p8 = por %p757_p7, %p756_p6 }
  0x15   :  { %p759_p9 = pnand %p758_p8, %p752_p5 }
  0x17   :  { %762 = shalt.err (!%p759_p9)
}
  0x18   :  { %s813_s25 = smov 128   ;;  %s814_s26 = smov 8  }
  0x19   :  { %23 = dma.hbm_to_vmem [thread:$0]  %s866_s0, 512, %s18_s23, [#allocation3], %s813_s25, %s813_s25, %s814_s26  }
  0x1a   :  { %s815_s29 = smov [#allocation7]  }
  0x1b   :  { %s41_s30 = sshll.u32 %s815_s29, 4  ;;  %s42_s30 = int_to_ptr.vmem [resolvable:$true] %s41_s30 }
  0x1c   :  { %s771_s1 = scalar_lea.vmem %s42_s30, 1024  ;;  %p776_p11 = scmp.lt.s32.totalorder %s42_s30, %s42_s30 }
  0x1d   :  { %p772_p10 = scmp.ne.s32.totalorder %s42_s30, %s771_s1  ;;  %p777_p12 = scmp.lt.s32.totalorder %s771_s1, %s771_s1 }
  0x1f   :  { %p778_p13 = por %p777_p12, %p776_p11 }
  0x21   :  { %p779_p0 = pnand %p778_p13, %p772_p10 }
  0x23   :  { %782 = shalt.err (!%p779_p0)
}
  0x24   :  { %47 = dma.hbm_to_vmem [thread:$0]  %s868_s2, 1024, %s42_s30, [#allocation6], %s810_s18, %s810_s18, %s811_s19  }
  0x25   :  { %803 = dma.done.wait [#allocation3], 512  }
  0x26   :  { %804 = vsyncadd [#allocation3], 4294966784 }
  0x27   :  { %805 = dma.done.wait [#allocation6], 2048  }
  0x28   :  { %806 = vsyncadd [#allocation6], 4294965248  ;;  %v707_v0 = vld [vmem:[#allocation5 + $0x38] sm:$0xff]   ;;  %v708_v1 = vld [vmem:[#allocation5 + $0x30] sm:$0xff]  }
  0x29   :  { %635 = vmatprep.subr.bf16.mxu0 %v707_v0  ;;  %v709_v2 = vld [vmem:[#allocation5 + $0x28] sm:$0xff]   ;;  %v710_v3 = vld [vmem:[#allocation5 + $0x20] sm:$0xff]   ;;  %v715_v6 = vld [vmem:[#allocation7 + $0x38] sm:$0xff]  }
  0x2a   :  { %636 = vmatpush3.bf16.msra.mxu0 %v707_v0  ;;  %v60_v4 = vld [vmem:[#allocation2] sm:$0xff]  ;;  %v716_v7 = vld [vmem:[#allocation7 + $0x30] sm:$0xff]   ;;  %v711_v8 = vld [vmem:[#allocation5 + $0x18] sm:$0xff]   ;;  %667 = vmatprep.subr.bf16.mxu1 %v715_v6 }
  0x2b   :  { %637 = vmatprep.subr.bf16.mxu0 %v708_v1  ;;  %v64_v5 = vunpack.c.l.s8.bf16 %v60_v4  ;;  %668 = vmatpush3.bf16.msra.mxu1 %v715_v6  ;;  %v717_v9 = vld [vmem:[#allocation7 + $0x28] sm:$0xff]   ;;  %v712_v10 = vld [vmem:[#allocation5 + $0x10] sm:$0xff]   ;;  %v718_v11 = vld [vmem:[#allocation7 + $0x20] sm:$0xff]   ;;  %v65_v17 = vunpack.c.h.s8.bf16 %v60_v4 }
  0x2c   :  { %669 = vmatprep.subr.bf16.mxu1 %v716_v7  ;;  %v713_v12 = vld [vmem:[#allocation5 + $0x8] sm:$0xff]   ;;  %v719_v13 = vld [vmem:[#allocation7 + $0x18] sm:$0xff]   ;;  %v714_v14 = vld [vmem:[#allocation5] sm:$0xff]  }
  0x2d   :  { %651 = vmatprep.mubr.bf16.mxu0 %v64_v5  ;;  %v720_v15 = vld [vmem:[#allocation7 + $0x10] sm:$0xff]   ;;  %v61_v16 = vld [vmem:[#allocation2 + $0x8] sm:$0xff]  ;;  %v63_v22 = vld [vmem:[#allocation2 + $0x18] sm:$0xff] }
  0x2e   :  { %638 = vmatpush3.bf16.msra.mxu0 %v708_v1  ;;  %v66_v18 = vunpack.c.l.s8.bf16 %v61_v16  ;;  %v62_v19 = vld [vmem:[#allocation2 + $0x10] sm:$0xff]  ;;  %v67_v20 = vunpack.c.h.s8.bf16 %v61_v16  ;;  %v70_v24 = vunpack.c.l.s8.bf16 %v63_v22  ;;  %v71_v25 = vunpack.c.h.s8.bf16 %v63_v22  ;;  %v721_v26 = vld [vmem:[#allocation7 + $0x8] sm:$0xff]   ;;  %v722_v27 = vld [vmem:[#allocation7] sm:$0xff]  }
  0x2f   :  { %639 = vmatprep.subr.bf16.mxu0 %v709_v2  ;;  %670 = vmatpush3.bf16.msra.mxu1 %v716_v7  ;;  %v68_v21 = vunpack.c.l.s8.bf16 %v62_v19  ;;  %v69_v23 = vunpack.c.h.s8.bf16 %v62_v19  ;;  %v515_v53 = vld [vmem:[%s869_s3] ss:$0 sm:$0xff]  ;;  %s816_s3 = smov [#allocation8]  }
  0x30   :  { %671 = vmatprep.subr.bf16.mxu1 %v717_v9  ;;  %s494_s7 = sshll.u32 %s816_s3, 4  ;;  %s495_s7 = int_to_ptr.vmem [resolvable:$true] %s494_s7 }
  0x31   :  { %s783_s8 = scalar_lea.vmem %s495_s7, 1024  ;;  %p788_p2 = scmp.lt.s32.totalorder %s495_s7, %s495_s7 }
  0x32   :  { %640 = vmatpush3.bf16.msra.mxu0 %v709_v2  ;;  %p784_p1 = scmp.ne.s32.totalorder %s495_s7, %s783_s8  ;;  %p789_p3 = scmp.lt.s32.totalorder %s783_s8, %s783_s8 }
  0x33   :  { %641 = vmatprep.subr.bf16.mxu0 %v710_v3  ;;  %672 = vmatpush3.bf16.msra.mxu1 %v717_v9 }
  0x34   :  { %673 = vmatprep.subr.bf16.mxu1 %v718_v11  ;;  %p790_p4 = por %p789_p3, %p788_p2 }
  0x36   :  { %642 = vmatpush3.bf16.msra.mxu0 %v710_v3  ;;  %p791_p5 = pnand %p790_p4, %p784_p1 }
  0x37   :  { %643 = vmatprep.subr.bf16.mxu0 %v711_v8  ;;  %674 = vmatpush3.bf16.msra.mxu1 %v718_v11 }
  0x38   :  { %675 = vmatprep.subr.bf16.mxu1 %v719_v13 }
  0x3a   :  { %644 = vmatpush3.bf16.msra.mxu0 %v711_v8 }
  0x3b   :  { %645 = vmatprep.subr.bf16.mxu0 %v712_v10  ;;  %676 = vmatpush3.bf16.msra.mxu1 %v719_v13 }
  0x3c   :  { %677 = vmatprep.subr.bf16.mxu1 %v720_v15 }
  0x3e   :  { %646 = vmatpush3.bf16.msra.mxu0 %v712_v10 }
  0x3f   :  { %647 = vmatprep.subr.bf16.mxu0 %v713_v12  ;;  %678 = vmatpush3.bf16.msra.mxu1 %v720_v15 }
  0x40   :  { %679 = vmatprep.subr.bf16.mxu1 %v721_v26 }
  0x42   :  { %648 = vmatpush3.bf16.msra.mxu0 %v713_v12 }
  0x43   :  { %649 = vmatprep.subr.bf16.mxu0 %v714_v14  ;;  %680 = vmatpush3.bf16.msra.mxu1 %v721_v26 }
  0x44   :  { %681 = vmatprep.subr.bf16.mxu1 %v722_v27 }
  0x46   :  { %650 = vmatpush3.bf16.msra.mxu0 %v714_v14 }
  0x47   :  { %682 = vmatpush3.bf16.msra.mxu1 %v722_v27 }
  0x49   :  { %652 = vmatmul.mubr.bf16.vlgmr.msra.gmra.mxu0 %v65_v17 }
  0x4a   :  { %655 = vmatprep.mubr.bf16.mxu0 %v66_v18 }
  0x51   :  { %656 = vmatmul.mubr.bf16.gmra.mxu0 %v67_v20 }
  0x52   :  { %659 = vmatprep.mubr.bf16.mxu0 %v68_v21 }
  0x59   :  { %660 = vmatmul.mubr.bf16.gmra.mxu0 %v69_v23 }
  0x5a   :  { %663 = vmatprep.mubr.bf16.mxu0 %v70_v24 }
  0x61   :  { %664 = vmatmul.mubr.bf16.gmra.mxu0 %v71_v25 }
 0x109   :  { %v653_v28 = vpop.f32.mrf.mxu0 }
 0x10b   :  { %v170_v29 = vpop.f32.mrf.mxu0 }
 0x10d   :  { %v654_v30 = vpop.f32.mrf.mxu0 }
 0x10e   :  { %v234_v33 = vpack.c.bf16 %v654_v30, %v653_v28 }
 0x10f   :  { %v173_v31 = vpop.f32.mrf.mxu0 }
 0x110   :  { %v233_v32 = vpack.c.bf16 %v173_v31, %v170_v29 }
 0x111   :  { %v657_v34 = vpop.f32.mrf.mxu0 }
 0x112   :  { %683 = vmatprep.mubr.bf16.mxu1 %v233_v32 }
 0x113   :  { %v186_v35 = vpop.f32.mrf.mxu0  ;;  %684 = vmatmul.mubr.bf16.vlgmr.msra.gmra.mxu1 %v234_v33 }
 0x115   :  { %v658_v36 = vpop.f32.mrf.mxu0 }
 0x116   :  { %v236_v39 = vpack.c.bf16 %v658_v36, %v657_v34 }
 0x117   :  { %v189_v37 = vpop.f32.mrf.mxu0 }
 0x118   :  { %v235_v38 = vpack.c.bf16 %v189_v37, %v186_v35 }
 0x119   :  { %v661_v40 = vpop.f32.mrf.mxu0 }
 0x11a   :  { %687 = vmatprep.mubr.bf16.mxu1 %v235_v38 }
 0x11b   :  { %v202_v41 = vpop.f32.mrf.mxu0  ;;  %688 = vmatmul.mubr.bf16.gmra.mxu1 %v236_v39 }
 0x11d   :  { %v662_v42 = vpop.f32.mrf.mxu0 }
 0x11e   :  { %v238_v45 = vpack.c.bf16 %v662_v42, %v661_v40 }
 0x11f   :  { %v205_v43 = vpop.f32.mrf.mxu0 }
 0x120   :  { %v237_v44 = vpack.c.bf16 %v205_v43, %v202_v41 }
 0x121   :  { %v665_v46 = vpop.f32.mrf.mxu0 }
 0x122   :  { %691 = vmatprep.mubr.bf16.mxu1 %v237_v44 }
 0x123   :  { %v218_v47 = vpop.f32.mrf.mxu0  ;;  %692 = vmatmul.mubr.bf16.gmra.mxu1 %v238_v45 }
 0x125   :  { %v666_v48 = vpop.f32.mrf.mxu0 }
 0x126   :  { %v240_v51 = vpack.c.bf16 %v666_v48, %v665_v46 }
 0x127   :  { %v221_v49 = vpop.f32.mrf.mxu0 }
 0x128   :  { %v239_v50 = vpack.c.bf16 %v221_v49, %v218_v47 }
 0x12a   :  { %695 = vmatprep.mubr.bf16.mxu1 %v239_v50 }
 0x12b   :  { %696 = vmatmul.mubr.bf16.gmra.mxu1 %v240_v51 }
 0x1d3   :  { %v685_v52 = vpop.f32.mrf.mxu1 }
 0x1d4   :  { %v355_v56 = vadd.f32 %v685_v52, %v515_v53 }
 0x1d5   :  { %v346_v54 = vpop.f32.mrf.mxu1 }
 0x1d6   :  { %v347_v59 = vadd.f32 %v515_v53, %v346_v54 }
 0x1d7   :  { %v686_v55 = vpop.f32.mrf.mxu1 }
 0x1d8   :  { %v358_v57 = vadd.f32 %v686_v55, %v515_v53 }
 0x1d9   :  { %v349_v58 = vpop.f32.mrf.mxu1 }
 0x1da   :  { %v564_v60 = vpack.c.bf16 %v358_v57, %v355_v56  ;;  %v350_v61 = vadd.f32 %v515_v53, %v349_v58 }
 0x1db   :  { %v689_v62 = vpop.f32.mrf.mxu1 }
 0x1dc   :  { %596 = vst [vmem:[#allocation8 + $0x8] sm:$0xff] %v564_v60   ;;  %v559_v63 = vpack.c.bf16 %v350_v61, %v347_v59  ;;  %v371_v2 = vadd.f32 %v689_v62, %v515_v53 }
 0x1dd   :  { %v362_v0 = vpop.f32.mrf.mxu1 }
 0x1de   :  { %560 = vst [vmem:[#allocation8] sm:$0xff] %v559_v63   ;;  %v363_v5 = vadd.f32 %v515_v53, %v362_v0 }
 0x1df   :  { %v690_v1 = vpop.f32.mrf.mxu1 }
 0x1e0   :  { %v374_v3 = vadd.f32 %v690_v1, %v515_v53 }
 0x1e1   :  { %v365_v4 = vpop.f32.mrf.mxu1 }
 0x1e2   :  { %v574_v6 = vpack.c.bf16 %v374_v3, %v371_v2  ;;  %v366_v7 = vadd.f32 %v515_v53, %v365_v4 }
 0x1e3   :  { %v693_v8 = vpop.f32.mrf.mxu1 }
 0x1e4   :  { %598 = vst [vmem:[#allocation8 + $0x18] sm:$0xff] %v574_v6   ;;  %v569_v9 = vpack.c.bf16 %v366_v7, %v363_v5  ;;  %v387_v12 = vadd.f32 %v693_v8, %v515_v53 }
 0x1e5   :  { %v378_v10 = vpop.f32.mrf.mxu1 }
 0x1e6   :  { %597 = vst [vmem:[#allocation8 + $0x10] sm:$0xff] %v569_v9   ;;  %v379_v15 = vadd.f32 %v515_v53, %v378_v10 }
 0x1e7   :  { %v694_v11 = vpop.f32.mrf.mxu1 }
 0x1e8   :  { %v390_v13 = vadd.f32 %v694_v11, %v515_v53 }
 0x1e9   :  { %v381_v14 = vpop.f32.mrf.mxu1 }
 0x1ea   :  { %v584_v16 = vpack.c.bf16 %v390_v13, %v387_v12  ;;  %v382_v17 = vadd.f32 %v515_v53, %v381_v14 }
 0x1eb   :  { %v697_v18 = vpop.f32.mrf.mxu1 }
 0x1ec   :  { %600 = vst [vmem:[#allocation8 + $0x28] sm:$0xff] %v584_v16   ;;  %v579_v19 = vpack.c.bf16 %v382_v17, %v379_v15  ;;  %v403_v22 = vadd.f32 %v697_v18, %v515_v53 }
 0x1ed   :  { %v394_v20 = vpop.f32.mrf.mxu1 }
 0x1ee   :  { %599 = vst [vmem:[#allocation8 + $0x20] sm:$0xff] %v579_v19   ;;  %v395_v25 = vadd.f32 %v515_v53, %v394_v20 }
 0x1ef   :  { %v698_v21 = vpop.f32.mrf.mxu1 }
 0x1f0   :  { %v406_v23 = vadd.f32 %v698_v21, %v515_v53 }
 0x1f1   :  { %v397_v24 = vpop.f32.mrf.mxu1 }
 0x1f2   :  { %v594_v26 = vpack.c.bf16 %v406_v23, %v403_v22  ;;  %v398_v27 = vadd.f32 %v515_v53, %v397_v24 }
 0x1f4   :  { %602 = vst [vmem:[#allocation8 + $0x38] sm:$0xff] %v594_v26   ;;  %v589_v28 = vpack.c.bf16 %v398_v27, %v395_v25 }
 0x1f6   :  { %601 = vst [vmem:[#allocation8 + $0x30] sm:$0xff] %v589_v28  }
 0x1f7   :  { %794 = shalt.err (!%p791_p5)
}
 0x1f8   :  { %500 = dma.vmem_to_hbm [thread:$0]  %s495_s7, 1024, %s870_s4, [#allocation4], %s810_s18, %s810_s18, %s811_s19  }
 0x1f9   :  { %807 = dma.done.wait [#allocation4], 1024  }
 0x1fa   :  { %808 = vsyncadd [#allocation4], 4294966272 }
 0x1fb   :  { %504 = vsyncpa [#allocation3], 1 }
 0x1fc   :  { %505 = vsyncpa [#allocation6], 1 }
 0x1fd   :  { %506 = vsyncpa [#allocation4], 1 }

</bundles_post_ra>
